<compile_context>
chip_gen: v5e
topology: v5e:2x2
jax: 0.10.0
libtpu: 0.0.40
codegen_flags: <defaults>
</compile_context>

<pallas_src>
import functools
import math

import jax
import jax.numpy as jnp
import numpy as np
from jax import lax
from jax.experimental import pallas as pl
from jax.experimental.pallas import tpu as pltpu

_K1D = (0.05, 0.25, 0.4, 0.25, 0.05)  # separable Gaussian taps (K2D = k^T k)
_EPS = 1e-3


def _edge_loss_kernel(d_ref, out_ref, *, H, W, eps, k):
    """One (sub_pack*H, lane_pack*W) collage of (x-y) -> (8, Wc) partial sums."""
    nrows, ncols = d_ref.shape          # (sub_pack * H, lane_pack * W)
    k0, k1, k2 = k[0], k[1], k[2]       # symmetric taps: k3 == k1, k4 == k0

    # ---- plane-local coordinates from 1-D iotas (no full-block integer mod) ----
    r1d = lax.broadcasted_iota(jnp.int32, (nrows, 1), 0)
    c1d = lax.broadcasted_iota(jnp.int32, (1, ncols), 1)
    rH1 = (r1d & (H - 1)) if (H & (H - 1)) == 0 else (r1d % H)
    cW1 = (c1d & (W - 1)) if (W & (W - 1)) == 0 else (c1d % W)
    # Boundary masks at full shape (cheap int32 broadcast + compare).  They both
    # realize replicate padding AND seal the seams between packed planes.
    rH = jnp.broadcast_to(rH1, (nrows, ncols))
    cW = jnp.broadcast_to(cW1, (nrows, ncols))
    row_first, row_last = rH == 0, rH == H - 1
    col_first, col_last = cW == 0, cW == W - 1
    # Even-pixel x4 re-injection, kept factored: (R,1)*(1,Wc) with 2.0*2.0 == 4.0
    # (multiplies by powers of two are exact in f32).
    row2 = jnp.where((rH1 & 1) == 0, 2.0, 0.0).astype(jnp.float32)
    col2 = jnp.where((cW1 & 1) == 0, 2.0, 0.0).astype(jnp.float32)

    def gauss(img):
        # Horizontal 5-tap (lane axis): rolled neighbours are clamped back to the
        # plane's own edge column via the boundary masks.
        l1 = jnp.where(col_first, img, pltpu.roll(img, 1, axis=1))          # img[clamp(w-1)]
        l2 = jnp.where(col_first, l1, pltpu.roll(l1, 1, axis=1))            # img[clamp(w-2)]
        r1 = jnp.where(col_last, img, pltpu.roll(img, ncols - 1, axis=1))   # img[clamp(w+1)]
        r2 = jnp.where(col_last, r1, pltpu.roll(r1, ncols - 1, axis=1))     # img[clamp(w+2)]
        t = k2 * img + k1 * (l1 + r1) + k0 * (l2 + r2)
        # Vertical 5-tap (sublane axis), same clamping trick per stacked plane.
        u1 = jnp.where(row_first, t, pltpu.roll(t, 1, axis=0))
        u2 = jnp.where(row_first, u1, pltpu.roll(u1, 1, axis=0))
        d1 = jnp.where(row_last, t, pltpu.roll(t, nrows - 1, axis=0))
        d2 = jnp.where(row_last, d1, pltpu.roll(d1, nrows - 1, axis=0))
        return k2 * t + k1 * (u1 + d1) + k0 * (u2 + d2)

    d0 = d_ref[...]
    # Linearity: laplacian(x) - laplacian(y) == d0 - gauss(mask4 * gauss(d0)).
    lap = d0 - gauss(gauss(d0) * row2 * col2)
    ch = jnp.sqrt(lap * lap + eps * eps)

    # Fold rows into an (8, Wc) lane-dense tile of partial sums; the tiny final
    # cross-lane reduce + mean happen in the wrapper.
    out_ref[0] = jnp.sum(ch.reshape(nrows // 8, 8, ncols), axis=0)


def edge_loss(x, y, *, eps=_EPS):
    """x, y: float NCHW arrays (matches the PyTorch module; C == 3 there)."""
    B, C, H, W = x.shape
    assert y.shape == x.shape
    N = B * C

    # Single difference tensor: gauss/laplacian are linear, so only (x - y) is
    # needed downstream.  XLA fuses the subtract with the pad/transpose below.
    d = (x.astype(jnp.float32) - y.astype(jnp.float32)).reshape(N, H, W)

    # ---------------- lane-dense collage packing ----------------
    if W > 128:
        lane_pack = 1  # TODO(synk): W % 128 != 0 here leaves partial-lane waste
    else:
        lane_pack = 128 // math.gcd(W, 128)     # Wc is a multiple of 128 (lane dense)
        if lane_pack * W > 512:                 # awkward W: keep the block narrow
            lane_pack = max(1, 128 // W)
    Wc = lane_pack * W

    m = 8 // math.gcd(H, 8)                     # plane-groups stacked so rows % 8 == 0
    groups = -(-N // lane_pack)                 # ceil: lane-groups of planes
    super_groups = -(-groups // m)              # m-sized stacks available

    rows_budget = max(m * H, min(1024, (1 << 20) // (4 * Wc)))
    sub_pack = m * max(1, rows_budget // (m * H))   # plane-groups stacked per block
    # Never overshoot the data; force >= 2 blocks when possible so the "parallel"
    # grid axis can shard across both TensorCores on v7x.
    target_blocks = 2 if super_groups >= 2 else 1
    sub_pack = min(sub_pack, m * (-(-super_groups // target_blocks)))

    n_blocks = -(-groups // sub_pack)
    groups_pad = n_blocks * sub_pack
    planes_pad = groups_pad * lane_pack
    n_pad = planes_pad - N                      # zero-padded planes
    R = sub_pack * H                            # block rows (multiple of 8)
    # TODO(synk): very large planes (R*Wc f32 >> VMEM) would need H-tiling with a
    # 4-row halo (two chained 5x5 blurs -> 9x9 support); not needed at these sizes.

    dp = jnp.pad(d, ((0, n_pad), (0, 0), (0, 0)))
    dp = dp.reshape(groups_pad, lane_pack, H, W).transpose(0, 2, 1, 3)
    dc = dp.reshape(groups_pad * H, Wc)         # (n_blocks * R, Wc)

    kernel = functools.partial(_edge_loss_kernel, H=H, W=W, eps=float(eps), k=_K1D)
    partial = pl.pallas_call(
        kernel,
        out_shape=jax.ShapeDtypeStruct((n_blocks, 8, Wc), jnp.float32),
        grid_spec=pltpu.PrefetchScalarGridSpec(
            num_scalar_prefetch=0,
            grid=(n_blocks,),
            in_specs=[pl.BlockSpec((R, Wc), lambda i: (i, 0))],
            out_specs=pl.BlockSpec((1, 8, Wc), lambda i: (i, 0, 0)),
        ),
        compiler_params=pltpu.CompilerParams(
            dimension_semantics=("parallel",),
            vmem_limit_bytes=32 * 1024 * 1024),
    )(dc)

    total = jnp.sum(partial)
    # Zero-padded planes (x - y == 0) each contribute exactly sqrt(eps^2) per pixel.
    pad_term = jnp.float32(n_pad * H * W) * jnp.sqrt(jnp.float32(eps * eps))
    return (total - pad_term) / jnp.float32(N * H * W)


# ---------------- pure-JAX reference (for a correctness check) ----------------
def _ref_edge_loss(x, y, eps=_EPS):
    k = jnp.asarray(_K1D, jnp.float32)
    k2d = jnp.outer(k, k)                        # (5, 5)
    C = x.shape[1]
    w = jnp.tile(k2d[None, None], (C, 1, 1, 1))  # (C, 1, 5, 5) depthwise

    def conv_gauss(img):
        p = jnp.pad(img, ((0, 0), (0, 0), (2, 2), (2, 2)), mode='edge')
        return lax.conv_general_dilated(
            p, w, window_strides=(1, 1), padding='VALID',
            dimension_numbers=('NCHW', 'OIHW', 'NCHW'),
            feature_group_count=C)

    def laplacian(cur):
        f = conv_gauss(cur)
        nf = jnp.zeros_like(f)
        nf = nf.at[:, :, ::2, ::2].set(f[:, :, ::2, ::2] * 4.0)
        return cur - conv_gauss(nf)

    d = laplacian(x) - laplacian(y)
    return jnp.mean(jnp.sqrt(d * d + eps * eps))


if __name__ == "__main__":
    key = jax.random.PRNGKey(0)
    kx, ky = jax.random.split(key)
    B, C, H, W = 2, 3, 16, 16   # module's Gaussian kernel is built for 3 channels
    x = jax.random.uniform(kx, (B, C, H, W), dtype=jnp.float32)
    y = jax.random.uniform(ky, (B, C, H, W), dtype=jnp.float32)

    loss = jax.block_until_ready(edge_loss(x, y))
    ref = jax.block_until_ready(_ref_edge_loss(x, y))

    assert np.allclose(np.asarray(loss), np.asarray(ref), rtol=1e-4, atol=1e-5), (
        loss, ref)
    print("KERNEL_OK")
</pallas_src>

<mosaic_0001>
module attributes {stable_mosaic.version = 11 : i64} {
  func.func @_edge_loss_kernel(%arg0: i32, %arg1: memref<16x128xf32, #tpu.memory_space<vmem>>, %arg2: memref<1x8x128xf32, #tpu.memory_space<vmem>>) attributes {dimension_semantics = [#tpu.dimension_semantics<parallel>], iteration_bounds = array<i64: 1>, scalar_prefetch = 0 : i64, scratch_operands = 0 : i64, tpu.core_type = #tpu.core_type<tc>, window_params = [{transform_indices = @transform_0, window_bounds = array<i64: 16, 128>}, {transform_indices = @transform_1, window_bounds = array<i64: 1, 8, 128>}]} {
    %0 = tpu.iota {dimensions = array<i32: 0>} : vector<16x1xi32>
    %1 = tpu.iota {dimensions = array<i32: 1>} : vector<1x128xi32>
    %c15_i32 = arith.constant 15 : i32
    %2 = vector.broadcast %c15_i32 : i32 to vector<16x1xi32>
    %3 = arith.andi %0, %2 : vector<16x1xi32>
    %c15_i32_0 = arith.constant 15 : i32
    %4 = vector.broadcast %c15_i32_0 : i32 to vector<1x128xi32>
    %5 = arith.andi %1, %4 : vector<1x128xi32>
    %6 = vector.shape_cast %3 : vector<16x1xi32> to vector<16x1xi32>
    %7 = vector.broadcast %6 : vector<16x1xi32> to vector<16x128xi32>
    %8 = vector.shape_cast %5 : vector<1x128xi32> to vector<1x128xi32>
    %9 = vector.broadcast %8 : vector<1x128xi32> to vector<16x128xi32>
    %c0_i32 = arith.constant 0 : i32
    %10 = vector.broadcast %c0_i32 : i32 to vector<16x128xi32>
    %11 = arith.cmpi eq, %7, %10 : vector<16x128xi32>
    %c15_i32_1 = arith.constant 15 : i32
    %12 = vector.broadcast %c15_i32_1 : i32 to vector<16x128xi32>
    %13 = arith.cmpi eq, %7, %12 : vector<16x128xi32>
    %c0_i32_2 = arith.constant 0 : i32
    %14 = vector.broadcast %c0_i32_2 : i32 to vector<16x128xi32>
    %15 = arith.cmpi eq, %9, %14 : vector<16x128xi32>
    %c15_i32_3 = arith.constant 15 : i32
    %16 = vector.broadcast %c15_i32_3 : i32 to vector<16x128xi32>
    %17 = arith.cmpi eq, %9, %16 : vector<16x128xi32>
    %c1_i32 = arith.constant 1 : i32
    %18 = vector.broadcast %c1_i32 : i32 to vector<16x1xi32>
    %19 = arith.andi %3, %18 : vector<16x1xi32>
    %c0_i32_4 = arith.constant 0 : i32
    %20 = vector.broadcast %c0_i32_4 : i32 to vector<16x1xi32>
    %21 = arith.cmpi eq, %19, %20 : vector<16x1xi32>
    %cst = arith.constant 2.000000e+00 : f32
    %cst_5 = arith.constant 0.000000e+00 : f32
    %22 = vector.broadcast %cst : f32 to vector<16x1xf32>
    %23 = vector.broadcast %cst_5 : f32 to vector<16x1xf32>
    %24 = arith.select %21, %22, %23 : vector<16x1xi1>, vector<16x1xf32>
    %c1_i32_6 = arith.constant 1 : i32
    %25 = vector.broadcast %c1_i32_6 : i32 to vector<1x128xi32>
    %26 = arith.andi %5, %25 : vector<1x128xi32>
    %c0_i32_7 = arith.constant 0 : i32
    %27 = vector.broadcast %c0_i32_7 : i32 to vector<1x128xi32>
    %28 = arith.cmpi eq, %26, %27 : vector<1x128xi32>
    %cst_8 = arith.constant 2.000000e+00 : f32
    %cst_9 = arith.constant 0.000000e+00 : f32
    %29 = vector.broadcast %cst_8 : f32 to vector<1x128xf32>
    %30 = vector.broadcast %cst_9 : f32 to vector<1x128xf32>
    %31 = arith.select %28, %29, %30 : vector<1x128xi1>, vector<1x128xf32>
    %c0 = arith.constant 0 : index
    %c0_10 = arith.constant 0 : index
    %32 = vector.load %arg1[%c0, %c0_10] : memref<16x128xf32, #tpu.memory_space<vmem>>, vector<16x128xf32>
    %c1_i32_11 = arith.constant 1 : i32
    %33 = tpu.dynamic_rotate %32 by %c1_i32_11 dim 1 : vector<16x128xf32>, i32 -> vector<16x128xf32>
    %34 = arith.select %15, %32, %33 : vector<16x128xi1>, vector<16x128xf32>
    %c1_i32_12 = arith.constant 1 : i32
    %35 = tpu.dynamic_rotate %34 by %c1_i32_12 dim 1 : vector<16x128xf32>, i32 -> vector<16x128xf32>
    %36 = arith.select %15, %34, %35 : vector<16x128xi1>, vector<16x128xf32>
    %c127_i32 = arith.constant 127 : i32
    %37 = tpu.dynamic_rotate %32 by %c127_i32 dim 1 : vector<16x128xf32>, i32 -> vector<16x128xf32>
    %38 = arith.select %17, %32, %37 : vector<16x128xi1>, vector<16x128xf32>
    %c127_i32_13 = arith.constant 127 : i32
    %39 = tpu.dynamic_rotate %38 by %c127_i32_13 dim 1 : vector<16x128xf32>, i32 -> vector<16x128xf32>
    %40 = arith.select %17, %38, %39 : vector<16x128xi1>, vector<16x128xf32>
    %cst_14 = arith.constant 4.000000e-01 : f32
    %41 = vector.broadcast %cst_14 : f32 to vector<16x128xf32>
    %42 = arith.mulf %41, %32 : vector<16x128xf32>
    %43 = arith.addf %34, %38 : vector<16x128xf32>
    %cst_15 = arith.constant 2.500000e-01 : f32
    %44 = vector.broadcast %cst_15 : f32 to vector<16x128xf32>
    %45 = arith.mulf %44, %43 : vector<16x128xf32>
    %46 = arith.addf %42, %45 : vector<16x128xf32>
    %47 = arith.addf %36, %40 : vector<16x128xf32>
    %cst_16 = arith.constant 5.000000e-02 : f32
    %48 = vector.broadcast %cst_16 : f32 to vector<16x128xf32>
    %49 = arith.mulf %48, %47 : vector<16x128xf32>
    %50 = arith.addf %46, %49 : vector<16x128xf32>
    %c1_i32_17 = arith.constant 1 : i32
    %51 = tpu.dynamic_rotate %50 by %c1_i32_17 dim 0 : vector<16x128xf32>, i32 -> vector<16x128xf32>
    %52 = arith.select %11, %50, %51 : vector<16x128xi1>, vector<16x128xf32>
    %c1_i32_18 = arith.constant 1 : i32
    %53 = tpu.dynamic_rotate %52 by %c1_i32_18 dim 0 : vector<16x128xf32>, i32 -> vector<16x128xf32>
    %54 = arith.select %11, %52, %53 : vector<16x128xi1>, vector<16x128xf32>
    %c15_i32_19 = arith.constant 15 : i32
    %55 = tpu.dynamic_rotate %50 by %c15_i32_19 dim 0 : vector<16x128xf32>, i32 -> vector<16x128xf32>
    %56 = arith.select %13, %50, %55 : vector<16x128xi1>, vector<16x128xf32>
    %c15_i32_20 = arith.constant 15 : i32
    %57 = tpu.dynamic_rotate %56 by %c15_i32_20 dim 0 : vector<16x128xf32>, i32 -> vector<16x128xf32>
    %58 = arith.select %13, %56, %57 : vector<16x128xi1>, vector<16x128xf32>
    %cst_21 = arith.constant 4.000000e-01 : f32
    %59 = vector.broadcast %cst_21 : f32 to vector<16x128xf32>
    %60 = arith.mulf %59, %50 : vector<16x128xf32>
    %61 = arith.addf %52, %56 : vector<16x128xf32>
    %cst_22 = arith.constant 2.500000e-01 : f32
    %62 = vector.broadcast %cst_22 : f32 to vector<16x128xf32>
    %63 = arith.mulf %62, %61 : vector<16x128xf32>
    %64 = arith.addf %60, %63 : vector<16x128xf32>
    %65 = arith.addf %54, %58 : vector<16x128xf32>
    %cst_23 = arith.constant 5.000000e-02 : f32
    %66 = vector.broadcast %cst_23 : f32 to vector<16x128xf32>
    %67 = arith.mulf %66, %65 : vector<16x128xf32>
    %68 = arith.addf %64, %67 : vector<16x128xf32>
    %69 = vector.broadcast %24 : vector<16x1xf32> to vector<16x128xf32>
    %70 = arith.mulf %68, %69 : vector<16x128xf32>
    %71 = vector.broadcast %31 : vector<1x128xf32> to vector<16x128xf32>
    %72 = arith.mulf %70, %71 : vector<16x128xf32>
    %c1_i32_24 = arith.constant 1 : i32
    %73 = tpu.dynamic_rotate %72 by %c1_i32_24 dim 1 : vector<16x128xf32>, i32 -> vector<16x128xf32>
    %74 = arith.select %15, %72, %73 : vector<16x128xi1>, vector<16x128xf32>
    %c1_i32_25 = arith.constant 1 : i32
    %75 = tpu.dynamic_rotate %74 by %c1_i32_25 dim 1 : vector<16x128xf32>, i32 -> vector<16x128xf32>
    %76 = arith.select %15, %74, %75 : vector<16x128xi1>, vector<16x128xf32>
    %c127_i32_26 = arith.constant 127 : i32
    %77 = tpu.dynamic_rotate %72 by %c127_i32_26 dim 1 : vector<16x128xf32>, i32 -> vector<16x128xf32>
    %78 = arith.select %17, %72, %77 : vector<16x128xi1>, vector<16x128xf32>
    %c127_i32_27 = arith.constant 127 : i32
    %79 = tpu.dynamic_rotate %78 by %c127_i32_27 dim 1 : vector<16x128xf32>, i32 -> vector<16x128xf32>
    %80 = arith.select %17, %78, %79 : vector<16x128xi1>, vector<16x128xf32>
    %cst_28 = arith.constant 4.000000e-01 : f32
    %81 = vector.broadcast %cst_28 : f32 to vector<16x128xf32>
    %82 = arith.mulf %81, %72 : vector<16x128xf32>
    %83 = arith.addf %74, %78 : vector<16x128xf32>
    %cst_29 = arith.constant 2.500000e-01 : f32
    %84 = vector.broadcast %cst_29 : f32 to vector<16x128xf32>
    %85 = arith.mulf %84, %83 : vector<16x128xf32>
    %86 = arith.addf %82, %85 : vector<16x128xf32>
    %87 = arith.addf %76, %80 : vector<16x128xf32>
    %cst_30 = arith.constant 5.000000e-02 : f32
    %88 = vector.broadcast %cst_30 : f32 to vector<16x128xf32>
    %89 = arith.mulf %88, %87 : vector<16x128xf32>
    %90 = arith.addf %86, %89 : vector<16x128xf32>
    %c1_i32_31 = arith.constant 1 : i32
    %91 = tpu.dynamic_rotate %90 by %c1_i32_31 dim 0 : vector<16x128xf32>, i32 -> vector<16x128xf32>
    %92 = arith.select %11, %90, %91 : vector<16x128xi1>, vector<16x128xf32>
    %c1_i32_32 = arith.constant 1 : i32
    %93 = tpu.dynamic_rotate %92 by %c1_i32_32 dim 0 : vector<16x128xf32>, i32 -> vector<16x128xf32>
    %94 = arith.select %11, %92, %93 : vector<16x128xi1>, vector<16x128xf32>
    %c15_i32_33 = arith.constant 15 : i32
    %95 = tpu.dynamic_rotate %90 by %c15_i32_33 dim 0 : vector<16x128xf32>, i32 -> vector<16x128xf32>
    %96 = arith.select %13, %90, %95 : vector<16x128xi1>, vector<16x128xf32>
    %c15_i32_34 = arith.constant 15 : i32
    %97 = tpu.dynamic_rotate %96 by %c15_i32_34 dim 0 : vector<16x128xf32>, i32 -> vector<16x128xf32>
    %98 = arith.select %13, %96, %97 : vector<16x128xi1>, vector<16x128xf32>
    %cst_35 = arith.constant 4.000000e-01 : f32
    %99 = vector.broadcast %cst_35 : f32 to vector<16x128xf32>
    %100 = arith.mulf %99, %90 : vector<16x128xf32>
    %101 = arith.addf %92, %96 : vector<16x128xf32>
    %cst_36 = arith.constant 2.500000e-01 : f32
    %102 = vector.broadcast %cst_36 : f32 to vector<16x128xf32>
    %103 = arith.mulf %102, %101 : vector<16x128xf32>
    %104 = arith.addf %100, %103 : vector<16x128xf32>
    %105 = arith.addf %94, %98 : vector<16x128xf32>
    %cst_37 = arith.constant 5.000000e-02 : f32
    %106 = vector.broadcast %cst_37 : f32 to vector<16x128xf32>
    %107 = arith.mulf %106, %105 : vector<16x128xf32>
    %108 = arith.addf %104, %107 : vector<16x128xf32>
    %109 = arith.subf %32, %108 : vector<16x128xf32>
    %110 = arith.mulf %109, %109 : vector<16x128xf32>
    %cst_38 = arith.constant 9.99999997E-7 : f32
    %111 = vector.broadcast %cst_38 : f32 to vector<16x128xf32>
    %112 = arith.addf %110, %111 : vector<16x128xf32>
    %113 = math.sqrt %112 : vector<16x128xf32>
    %114 = vector.shape_cast %113 : vector<16x128xf32> to vector<2x8x128xf32>
    %cst_39 = arith.constant dense<0.000000e+00> : vector<8x128xf32>
    %115 = vector.multi_reduction <add>, %114, %cst_39 [0] : vector<2x8x128xf32> to vector<8x128xf32>
    %c0_40 = arith.constant 0 : index
    %c0_41 = arith.constant 0 : index
    %c0_42 = arith.constant 0 : index
    %116 = vector.load %arg2[%c0_40, %c0_41, %c0_42] : memref<1x8x128xf32, #tpu.memory_space<vmem>>, vector<1x8x128xf32>
    %117 = vector.shape_cast %116 : vector<1x8x128xf32> to vector<8x128xf32>
    %118 = vector.shape_cast %115 : vector<8x128xf32> to vector<1x8x128xf32>
    tpu.vector_store %arg2[%c0_40, %c0_41, %c0_42], %118 {strides = array<i32>} : memref<1x8x128xf32, #tpu.memory_space<vmem>>, vector<1x8x128xf32>,
    return
  }
  func.func @transform_0(%arg0: i32) -> (i32, i32) {
    %c0_i32 = arith.constant 0 : i32
    %c0_i32_0 = arith.constant 0 : i32
    return %arg0, %c0_i32 : i32, i32
  }
  func.func @transform_1(%arg0: i32) -> (i32, i32, i32) {
    %c0_i32 = arith.constant 0 : i32
    %c0_i32_0 = arith.constant 0 : i32
    %c0_i32_1 = arith.constant 0 : i32
    return %arg0, %c0_i32, %c0_i32_0 : i32, i32, i32
  }
}

</mosaic_0001>

<bundles_post_ra>
// kernel: tpu_custom_call.1
= control target key start
LH: loop header
LB: loop body
LE: loop exit
PB: predicated region body
PF: predicated region fallthrough
CT: control target
= control target key end

     0   :  { %6 = vsyncpa [#allocation3], 0  ;;  %s478_s0 = inlined_call_operand.hbm [shape: f32[16,128], index: 0, kind: input, shape index: {}]   ;;  %s479_s1 = inlined_call_operand.hbm [shape: f32[1,8,128], index: 1, kind: output, shape index: {}]  }
   0x1   :  { %7 = vsyncpa [#allocation4], 0  ;;  %s12_s8 = sshll.u32 %s478_s0, 4  ;;  %s320_s9 = smov [#allocation2]   ;;  %s13_s8 = int_to_ptr.hbm [resolvable:$true] %s12_s8 }
   0x2   :  { %s14_s10 = sshll.u32 %s320_s9, 4  ;;  %s321_s11 = smov 128   ;;  %s15_s10 = int_to_ptr.vmem [resolvable:$true] %s14_s10 }
   0x3   :  { %s322_s12 = smov 8  }
   0x4   :  { %20 = dma.hbm_to_vmem [thread:$0]  %s13_s8, 256, %s15_s10, [#allocation3], %s321_s11, %s321_s11, %s322_s12  }
   0x5   :  { %316 = dma.done.wait [#allocation3], 256  }
   0x6   :  { %317 = vsyncadd [#allocation3], 4294967040  ;;  %v340_v0 = vld [vmem:[#allocation2] sm:$0xff]  ;;  %s323_s13 = smov 127   ;;  %s324_s14 = smov 1   ;;  %v346_v1 = vld [vmem:[#allocation2 + $0x8] sm:$0xff]  ;;  %v25_v2 = vlaneseq }
   0x7   :  { %62 = vrot.lane.b32.xlu1 %v340_v0, %s323_s13  ;;  %50 = vrot.lane.b32.xlu0 %v340_v0, %s324_s14  ;;  %v74_v22 = vmul.f32 0.4, %v340_v0  ;;  %v75_v26 = vmul.f32 0.4, %v346_v1  ;;  %s326_s0 = smov [#allocation5]   ;;  %s247_s18 = sshll.u32 %s479_s1, 4  ;;  %s248_s18 = int_to_ptr.hbm [resolvable:$true] %s247_s18 }
   0x8   :  { %v29_v3 = vand.u32 127, %v25_v2  ;;  %v378_v19 = vshrl.u32 %v25_v2, 7  ;;  %s245_s15 = sshll.u32 %s326_s0, 4  ;;  %s246_s15 = int_to_ptr.vmem [resolvable:$true] %s245_s15 }
   0xa   :  { %v352_v4 = vand.u32 15, %v29_v3  ;;  %v27_v24 = vadd.s32 8, %v378_v19  ;;  %v30_v33 = vand.u32 15, %v378_v19  ;;  %vm90_vm2 = vcmp.lt.s32.totalorder %v378_v19, 1 }
   0xb   :  { %vm103_vm3 = vcmp.lt.s32.totalorder %v378_v19, 7 }
   0xc   :  { %vm38_vm0 = vcmp.eq.s32.totalorder %v352_v4, 15  ;;  %vm37_vm1 = vcmp.eq.s32.totalorder %v352_v4, 0  ;;  %v31_v34 = vand.u32 15, %v27_v24  ;;  %vm392_vm4 = vcmp.eq.s32.totalorder %v30_v33, 0 }
   0xd   :  { %v39_v46 = vand.u32 1, %v30_v33  ;;  %v45_v61 = vand.u32 1, %v352_v4 }
   0xe   :  { %vm396_vm5 = vcmp.eq.s32.totalorder %v31_v34, 15  ;;  %v40_v45 = vand.u32 1, %v31_v34 }
   0xf   :  { %64 = vrot.lane.b32.xlu1 %v346_v1, %s323_s13  ;;  %52 = vrot.lane.b32.xlu0 %v346_v1, %s324_s14  ;;  %vm41_vm7 = vcmp.eq.s32.totalorder %v39_v46, 0  ;;  %vm46_vm8 = vcmp.eq.s32.totalorder %v45_v61, 0 }
  0x10   :  { %vm42_vm6 = vcmp.eq.s32.totalorder %v40_v45, 0 }
  0x79   :  { %v63_v5 = vpop.permute.xlu1 %62  ;;  %v51_v6 = vpop.permute.xlu0 %50 }
  0x7a   :  { %v66_v7 = vsel %vm38_vm0, %v340_v0, %v63_v5  ;;  %v54_v8 = vsel %vm37_vm1, %v340_v0, %v51_v6 }
  0x7b   :  { %68 = vrot.lane.b32.xlu0 %v66_v7, %s323_s13  ;;  %56 = vrot.lane.b32.xlu2 %v54_v8, %s324_s14  ;;  %v76_v9 = vadd.f32 %v66_v7, %v54_v8 }
  0x7d   :  { %v78_v23 = vmul.f32 0.25, %v76_v9 }
  0x7f   :  { %v80_v31 = vadd.f32 %v78_v23, %v74_v22 }
  0x81   :  { %v65_v10 = vpop.permute.xlu1 %64  ;;  %v53_v11 = vpop.permute.xlu0 %52 }
  0x82   :  { %v67_v12 = vsel %vm38_vm0, %v346_v1, %v65_v10  ;;  %v55_v13 = vsel %vm37_vm1, %v346_v1, %v53_v11 }
  0x83   :  { %70 = vrot.lane.b32.xlu1 %v67_v12, %s323_s13  ;;  %58 = vrot.lane.b32.xlu2 %v55_v13, %s324_s14  ;;  %v77_v14 = vadd.f32 %v67_v12, %v55_v13 }
  0x85   :  { %v79_v27 = vmul.f32 0.25, %v77_v14 }
  0x87   :  { %v81_v35 = vadd.f32 %v79_v27, %v75_v26 }
  0xd5   :  { %v57_v15 = vpop.permute.xlu2 %56 }
  0xd6   :  { %v60_v17 = vsel %vm37_vm1, %v340_v0, %v57_v15  ;;  %v325_v15 = vmov 0.0  }
  0xdd   :  { %v59_v21 = vpop.permute.xlu2 %58 }
  0xde   :  { %v61_v25 = vsel %vm37_vm1, %v346_v1, %v59_v21  ;;  %v47_v21 = vsel %vm46_vm8, 2.0, %v325_v15 }
  0xed   :  { %v69_v16 = vpop.permute.xlu0 %68 }
  0xee   :  { %v72_v18 = vsel %vm38_vm0, %v340_v0, %v69_v16  ;;  %v44_v16 = vsel %vm42_vm6, 2.0, %v325_v15 }
  0xef   :  { %v82_v20 = vadd.f32 %v72_v18, %v60_v17  ;;  %v43_v17 = vsel %vm41_vm7, 2.0, %v325_v15 }
  0xf1   :  { %v84_v28 = vmul.f32 0.05, %v82_v20 }
  0xf3   :  { %v86_v36 = vadd.f32 %v84_v28, %v80_v31 }
  0xf5   :  { %v71_v29 = vpop.permute.xlu1 %70  ;;  %v88_v41 = vrot.slane %v86_v36, 7  ;;  %v101_v42 = vrot.slane %v86_v36, 1  ;;  %v114_v59 = vmul.f32 0.4, %v86_v36 }
  0xf6   :  { %v73_v30 = vsel %vm38_vm0, %v346_v1, %v71_v29 }
  0xf7   :  { %v83_v32 = vadd.f32 %v73_v30, %v61_v25 }
  0xf9   :  { %v85_v37 = vmul.f32 0.05, %v83_v32 }
  0xfb   :  { %v87_v38 = vadd.f32 %v85_v37, %v81_v35 }
  0xfd   :  { %v89_v43 = vrot.slane %v87_v38, 7  ;;  %v102_v44 = vrot.slane %v87_v38, 1  ;;  %v115_v60 = vmul.f32 0.4, %v87_v38 }
  0xff   :  { %v91_v47 = vsel %vm90_vm2, %v88_v41, %v89_v43  ;;  %v92_v48 = vsel %vm90_vm2, %v89_v43, %v88_v41  ;;  %v104_v49 = vsel %vm103_vm3, %v101_v42, %v102_v44  ;;  %v105_v50 = vsel %vm103_vm3, %v102_v44, %v101_v42 }
 0x100   :  { %v93_v51 = vsel %vm392_vm4, %v86_v36, %v92_v48  ;;  %v96_v52 = vrot.slane %v91_v47, 7  ;;  %v107_v53 = vsel %vm396_vm5, %v87_v38, %v105_v50  ;;  %v108_v54 = vrot.slane %v104_v49, 1 }
 0x101   :  { %v95_v55 = vrot.slane %v93_v51, 7  ;;  %v109_v56 = vrot.slane %v107_v53, 1  ;;  %v116_v57 = vadd.f32 %v104_v49, %v93_v51  ;;  %v117_v58 = vadd.f32 %v107_v53, %v91_v47 }
 0x103   :  { %v97_v62 = vsel %vm90_vm2, %v95_v55, %v96_v52  ;;  %v98_v63 = vsel %vm90_vm2, %v96_v52, %v95_v55  ;;  %v110_v2 = vsel %vm103_vm3, %v108_v54, %v109_v56  ;;  %v111_v3 = vsel %vm103_vm3, %v109_v56, %v108_v54 }
 0x104   :  { %v99_v5 = vsel %vm392_vm4, %v86_v36, %v98_v63  ;;  %v113_v6 = vsel %vm396_vm5, %v87_v38, %v111_v3  ;;  %v118_v7 = vmul.f32 0.25, %v116_v57  ;;  %v119_v8 = vmul.f32 0.25, %v117_v58 }
 0x105   :  { %v122_v9 = vadd.f32 %v110_v2, %v99_v5  ;;  %v123_v10 = vadd.f32 %v113_v6, %v97_v62 }
 0x106   :  { %v120_v11 = vadd.f32 %v118_v7, %v114_v59  ;;  %v121_v12 = vadd.f32 %v119_v8, %v115_v60 }
 0x107   :  { %v124_v13 = vmul.f32 0.05, %v122_v9  ;;  %v125_v14 = vmul.f32 0.05, %v123_v10 }
 0x109   :  { %v126_v18 = vadd.f32 %v124_v13, %v120_v11  ;;  %v127_v20 = vadd.f32 %v125_v14, %v121_v12 }
 0x10b   :  { %v129_v22 = vmul.f32 %v127_v20, %v44_v16  ;;  %v128_v23 = vmul.f32 %v126_v18, %v43_v17 }
 0x10d   :  { %v130_v24 = vmul.f32 %v128_v23, %v47_v21  ;;  %v131_v25 = vmul.f32 %v129_v22, %v47_v21 }
 0x10f   :  { %144 = vrot.lane.b32.xlu1 %v130_v24, %s323_s13  ;;  %132 = vrot.lane.b32.xlu2 %v130_v24, %s324_s14  ;;  %v156_v45 = vmul.f32 0.4, %v130_v24  ;;  %v157_v52 = vmul.f32 0.4, %v131_v25 }
 0x110   :  { %134 = vrot.lane.b32.xlu0 %v131_v25, %s324_s14 }
 0x117   :  { %146 = vrot.lane.b32.xlu2 %v131_v25, %s323_s13 }
 0x169   :  { %v133_v26 = vpop.permute.xlu2 %132 }
 0x16a   :  { %v136_v27 = vsel %vm37_vm1, %v130_v24, %v133_v26 }
 0x16b   :  { %138 = vrot.lane.b32.xlu0 %v136_v27, %s324_s14 }
 0x171   :  { %v147_v28 = vpop.permute.xlu2 %146 }
 0x172   :  { %v149_v29 = vsel %vm38_vm0, %v131_v25, %v147_v28 }
 0x173   :  { %152 = vrot.lane.b32.xlu0 %v149_v29, %s323_s13 }
 0x181   :  { %v145_v30 = vpop.permute.xlu1 %144 }
 0x182   :  { %v135_v31 = vpop.permute.xlu0 %134  ;;  %v148_v32 = vsel %vm38_vm0, %v130_v24, %v145_v30 }
 0x183   :  { %v158_v33 = vadd.f32 %v148_v32, %v136_v27  ;;  %150 = vrot.lane.b32.xlu2 %v148_v32, %s323_s13  ;;  %v137_v34 = vsel %vm37_vm1, %v131_v25, %v135_v31 }
 0x184   :  { %140 = vrot.lane.b32.xlu1 %v137_v34, %s324_s14  ;;  %v159_v35 = vadd.f32 %v149_v29, %v137_v34 }
 0x185   :  { %v160_v43 = vmul.f32 0.25, %v158_v33 }
 0x186   :  { %v161_v46 = vmul.f32 0.25, %v159_v35 }
 0x187   :  { %v162_v51 = vadd.f32 %v160_v43, %v156_v45 }
 0x188   :  { %v163_v54 = vadd.f32 %v161_v46, %v157_v52 }
 0x1dd   :  { %v139_v36 = vpop.permute.xlu0 %138  ;;  %v151_v37 = vpop.permute.xlu2 %150 }
 0x1de   :  { %v154_v38 = vsel %vm38_vm0, %v130_v24, %v151_v37  ;;  %v142_v41 = vsel %vm37_vm1, %v130_v24, %v139_v36 }
 0x1df   :  { %v164_v42 = vadd.f32 %v154_v38, %v142_v41 }
 0x1e1   :  { %v166_v47 = vmul.f32 0.05, %v164_v42 }
 0x1e3   :  { %v168_v55 = vadd.f32 %v166_v47, %v162_v51 }
 0x1e5   :  { %v153_v44 = vpop.permute.xlu0 %152  ;;  %v170_v58 = vrot.slane %v168_v55, 7  ;;  %v182_v59 = vrot.slane %v168_v55, 1  ;;  %v194_v12 = vmul.f32 0.4, %v168_v55 }
 0x1e6   :  { %v155_v49 = vsel %vm38_vm0, %v131_v25, %v153_v44 }
 0x1f6   :  { %v141_v48 = vpop.permute.xlu1 %140 }
 0x1f7   :  { %v143_v50 = vsel %vm37_vm1, %v131_v25, %v141_v48 }
 0x1f8   :  { %v165_v53 = vadd.f32 %v155_v49, %v143_v50 }
 0x1fa   :  { %v167_v56 = vmul.f32 0.05, %v165_v53 }
 0x1fc   :  { %v169_v57 = vadd.f32 %v167_v56, %v163_v54 }
 0x1fe   :  { %v171_v60 = vrot.slane %v169_v57, 7  ;;  %v183_v61 = vrot.slane %v169_v57, 1  ;;  %v195_v13 = vmul.f32 0.4, %v169_v57 }
 0x200   :  { %v172_v62 = vsel %vm90_vm2, %v170_v58, %v171_v60  ;;  %v173_v63 = vsel %vm90_vm2, %v171_v60, %v170_v58  ;;  %v184_v4 = vsel %vm103_vm3, %v182_v59, %v183_v61  ;;  %v185_v2 = vsel %vm103_vm3, %v183_v61, %v182_v59 }
 0x201   :  { %v174_v3 = vsel %vm392_vm4, %v168_v55, %v173_v63  ;;  %v177_v5 = vrot.slane %v172_v62, 7  ;;  %v187_v6 = vsel %vm396_vm5, %v169_v57, %v185_v2  ;;  %v188_v7 = vrot.slane %v184_v4, 1 }
 0x202   :  { %v176_v8 = vrot.slane %v174_v3, 7  ;;  %v189_v9 = vrot.slane %v187_v6, 1  ;;  %v196_v10 = vadd.f32 %v184_v4, %v174_v3  ;;  %v197_v11 = vadd.f32 %v187_v6, %v172_v62 }
 0x204   :  { %v178_v14 = vsel %vm90_vm2, %v176_v8, %v177_v5  ;;  %v179_v15 = vsel %vm90_vm2, %v177_v5, %v176_v8  ;;  %v190_v16 = vsel %vm103_vm3, %v188_v7, %v189_v9  ;;  %v191_v17 = vsel %vm103_vm3, %v189_v9, %v188_v7 }
 0x205   :  { %v180_v18 = vsel %vm392_vm4, %v168_v55, %v179_v15  ;;  %v193_v20 = vsel %vm396_vm5, %v169_v57, %v191_v17  ;;  %v198_v21 = vmul.f32 0.25, %v196_v10  ;;  %v199_v22 = vmul.f32 0.25, %v197_v11 }
 0x206   :  { %v202_v23 = vadd.f32 %v190_v16, %v180_v18  ;;  %v203_v24 = vadd.f32 %v193_v20, %v178_v14 }
 0x207   :  { %v200_v25 = vadd.f32 %v198_v21, %v194_v12  ;;  %v201_v26 = vadd.f32 %v199_v22, %v195_v13 }
 0x208   :  { %v204_v27 = vmul.f32 0.05, %v202_v23  ;;  %v205_v28 = vmul.f32 0.05, %v203_v24 }
 0x20a   :  { %v206_v29 = vadd.f32 %v204_v27, %v200_v25  ;;  %v207_v30 = vadd.f32 %v205_v28, %v201_v26 }
 0x20c   :  { %v208_v31 = vsub.f32 %v340_v0, %v206_v29  ;;  %v209_v19 = vsub.f32 %v346_v1, %v207_v30 }
 0x20e   :  { %v210_v32 = vmul.f32 %v208_v31, %v208_v31  ;;  %v211_v39 = vmul.f32 %v209_v19, %v209_v19 }
 0x210   :  { %v212_v33 = vadd.f32 1e-06, %v210_v32  ;;  %v213_v34 = vadd.f32 1e-06, %v211_v39 }
 0x212   :  { %264 = vrsqrt.f32 %v212_v33  ;;  %vm221_vm9 = vcmp.eq.f32.partialorder %v212_v33, inf  ;;  %v224_v1 = vand.u32 2147483648, %v212_v33  ;;  %vm223_vm10 = vcmp.eq.f32.partialorder %v212_v33, 0.0 }
 0x213   :  { %266 = vrsqrt.f32 %v213_v34  ;;  %vm233_vm11 = vcmp.eq.f32.partialorder %v213_v34, inf  ;;  %v236_v50 = vand.u32 2147483648, %v213_v34  ;;  %vm235_vm12 = vcmp.eq.f32.partialorder %v213_v34, 0.0 }
 0x218   :  { %v265_v40 = vpop.eup %264 }
 0x219   :  { %v267_v35 = vpop.eup %266  ;;  %v215_v36 = vmul.f32 %v265_v40, %v212_v33 }
 0x21a   :  { %v227_v37 = vmul.f32 %v267_v35, %v213_v34 }
 0x21b   :  { %v216_v38 = vmul.f32 %v265_v40, %v215_v36 }
 0x21c   :  { %v228_v41 = vmul.f32 %v267_v35, %v227_v37 }
 0x21d   :  { %v217_v42 = vmul.f32 0.5, %v216_v38 }
 0x21e   :  { %v229_v43 = vmul.f32 0.5, %v228_v41 }
 0x21f   :  { %v218_v44 = vsub.f32 1.5, %v217_v42 }
 0x220   :  { %v230_v45 = vsub.f32 1.5, %v229_v43 }
 0x221   :  { %v219_v46 = vmul.f32 %v265_v40, %v218_v44 }
 0x222   :  { %v231_v0 = vmul.f32 %v267_v35, %v230_v45 }
 0x223   :  { %v220_v47 = vmul.f32 %v219_v46, %v212_v33 }
 0x224   :  { %v232_v48 = vmul.f32 %v231_v0, %v213_v34 }
 0x225   :  { %v222_v49 = vsel %vm221_vm9, %v212_v33, %v220_v47 }
 0x226   :  { %v225_v51 = vsel %vm223_vm10, %v224_v1, %v222_v49  ;;  %v234_v52 = vsel %vm233_vm11, %v213_v34, %v232_v48 }
 0x227   :  { %v237_v53 = vsel %vm235_vm12, %v236_v50, %v234_v52 }
 0x228   :  { %v238_v54 = vadd.f32 %v237_v53, %v225_v51 }
 0x22a   :  { %239 = vst [vmem:[#allocation5] sm:$0xff] %v238_v54 }
 0x22b   :  { %250 = dma.vmem_to_hbm [thread:$0]  %s246_s15, 128, %s248_s18, [#allocation4]  }
 0x22c   :  { %318 = dma.done.wait [#allocation4], 128  }
 0x22d   :  { %319 = vsyncadd [#allocation4], 4294967168 }
 0x22e   :  { %255 = vsyncpa [#allocation3], 1 }
 0x22f   :  { %256 = vsyncpa [#allocation4], 1 }

</bundles_post_ra>
